<compile_context>
chip_gen: v7x
topology: tpu7x:2x2x1
jax: 0.10.0
libtpu: 0.0.40
codegen_flags: <defaults>
</compile_context>

<pallas_src>
import functools

import jax
import jax.numpy as jnp
import numpy as np
from jax.experimental import pallas as pl
from jax.experimental.pallas import tpu as pltpu


# ---------------------------------------------------------------------------
# Packed-weight-slab layout (all section offsets sublane/lane aligned)
# ---------------------------------------------------------------------------
def _round_up(x, m):
    return ((x + m - 1) // m) * m


def _slab_layout(H, O):
    """Row/lane layout of the single packed weight slab."""
    r_vec = _round_up(H, 8)            # row r_vec   : W_ih row (4H,)
                                       # row r_vec+1 : b_ih + b_hh (4H,)
    r_af = _round_up(r_vec + 2, 8)     # rows r_af.. : [W_attn^T | W_fc^T[:H] | W_fc^T[H:]]
    r_afb = _round_up(r_af + H, 8)     # row r_afb   : [b_attn | b_fc | 0]
    rows = _round_up(r_afb + 1, 8)
    lanes = _round_up(max(4 * H, H + 2 * O), 128)
    return r_vec, r_af, r_afb, rows, lanes


# ---------------------------------------------------------------------------
# Pallas kernel: T decoder steps in one call (grid axis 0 == time, sequential)
# ---------------------------------------------------------------------------
def decoder_attn_kernel(x_ref, init_ref, enc_ref, w_ref, out_ref, hc_ref, *, H, O):
    """One DecoderAttn.forward step per grid iteration.

    x_ref   : (T, B, 1)     decoder inputs (resident, indexed by t)
    init_ref: (B, 2H)       [h0 | c0], read only at t == 0
    enc_ref : (B, S, H)     encoder outputs (resident)
    w_ref   : (rows, lanes) packed weight slab (resident)
    out_ref : (1, B, PACK)  per-step packed output [logits | h | c | attn | pad]
    hc_ref  : (B, 2H)       VMEM scratch carrying the recurrent state
    """
    t = pl.program_id(0)
    B, S, _ = enc_ref.shape
    r_vec, r_af, r_afb, _, _ = _slab_layout(H, O)

    @pl.when(t == 0)
    def _():
        hc_ref[...] = init_ref[...]

    h = hc_ref[:, 0:H]
    c = hc_ref[:, H:2 * H]
    x = x_ref[t]                                   # (B, 1) input for step t

    # ---- LSTM gates (order i|f|g|o): one lane-dense (H,4H) MXU push; the
    #      K=1 input contraction stays on the VPU as a broadcast multiply. ----
    gates = (
        jnp.dot(h, w_ref[0:H, 0:4 * H], preferred_element_type=jnp.float32)
        + x * w_ref[r_vec:r_vec + 1, 0:4 * H]      # x @ W_ih^T
        + w_ref[r_vec + 1:r_vec + 2, 0:4 * H]      # b_ih + b_hh (combined)
    )
    i_g = jax.nn.sigmoid(gates[:, 0:H])
    f_g = jax.nn.sigmoid(gates[:, H:2 * H])
    g_g = jnp.tanh(gates[:, 2 * H:3 * H])
    o_g = jax.nn.sigmoid(gates[:, 3 * H:4 * H])
    c_new = f_g * c + i_g * g_g
    h_new = o_g * jnp.tanh(c_new)                  # (B, H) == LSTM output (seq len 1)

    # ---- attn query + fc "output half" in a single MXU push ----
    qa = (
        jnp.dot(h_new, w_ref[r_af:r_af + H, 0:H + O],
                preferred_element_type=jnp.float32)
        + w_ref[r_afb:r_afb + 1, 0:H + O]
    )
    q = qa[:, 0:H]                                 # h_new @ W_attn^T + b_attn
    logits_a = qa[:, H:H + O]                      # h_new @ W_fc^T[:H] + b_fc

    # ---- attention scores / softmax / context (VPU mul + XLU reduce) ----
    enc = enc_ref[...]
    scores = jnp.sum(q[:, None, :] * enc, axis=-1)            # (B, S)
    scores = scores - jnp.max(scores, axis=-1, keepdims=True)
    ex = jnp.exp(scores)
    attn_w = ex / jnp.sum(ex, axis=-1, keepdims=True)
    context = jnp.sum(attn_w[:, :, None] * enc, axis=1)       # (B, H)

    # ---- logits: split-fc accumulation (no concat relayout) ----
    logits = logits_a + jnp.dot(
        context, w_ref[r_af:r_af + H, H + O:H + 2 * O],
        preferred_element_type=jnp.float32)

    # ---- carry recurrent state; single lane-dense packed store per step ----
    hc_ref[...] = jnp.concatenate([h_new, c_new], axis=-1)

    parts = [logits, h_new, c_new, attn_w]
    pad_w = out_ref.shape[2] - (O + 2 * H + S)
    if pad_w > 0:                                   # static guard (edge case pad_w == 0)
        parts.append(jnp.zeros((B, pad_w), jnp.float32))
    out_ref[0] = jnp.concatenate(parts, axis=-1)


# ---------------------------------------------------------------------------
# Wrappers
# ---------------------------------------------------------------------------
def decoder_attn_decode(params, x_seq, hidden, encoder_outputs):
    """Runs T DecoderAttn.forward steps inside ONE pallas_call.

    x_seq           : (T, B, 1) decoder inputs per step (teacher forcing)
    hidden          : (h0, c0), each (1, B, H)
    encoder_outputs : (B, S, H)
    Returns per-step logits (T,B,O), h (T,B,H), c (T,B,H), attn (T,B,S).
    """
    h0, c0 = hidden
    B, S, H = encoder_outputs.shape
    O = params["output_dim"]
    T = x_seq.shape[0]
    _, _, _, rows, lanes = _slab_layout(H, O)
    pack_w = _round_up(O + 2 * H + S, 128)

    init_state = jnp.concatenate([h0[0], c0[0]], axis=-1).astype(jnp.float32)  # (B, 2H)
    x_seq = x_seq.astype(jnp.float32)
    enc = encoder_outputs.astype(jnp.float32)   # cast once, not per step

    kernel = functools.partial(decoder_attn_kernel, H=H, O=O)
    packed = pl.pallas_call(
        kernel,
        out_shape=jax.ShapeDtypeStruct((T, B, pack_w), jnp.float32),
        grid_spec=pltpu.PrefetchScalarGridSpec(
            num_scalar_prefetch=0,
            grid=(T,),
            in_specs=[
                pl.BlockSpec((T, B, 1), lambda t: (0, 0, 0)),    # x_seq (resident)
                pl.BlockSpec((B, 2 * H), lambda t: (0, 0)),      # initial h|c
                pl.BlockSpec((B, S, H), lambda t: (0, 0, 0)),    # encoder outputs (resident)
                pl.BlockSpec((rows, lanes), lambda t: (0, 0)),   # packed weights (resident)
            ],
            out_specs=pl.BlockSpec((1, B, pack_w), lambda t: (t, 0, 0)),
            scratch_shapes=[pltpu.VMEM((B, 2 * H), jnp.float32)],
        ),
        compiler_params=pltpu.CompilerParams(
            dimension_semantics=("arbitrary",)),
    )(x_seq, init_state, enc, params["w_slab"])

    logits = packed[:, :, 0:O]
    h_seq = packed[:, :, O:O + H]
    c_seq = packed[:, :, O + H:O + 2 * H]
    attn_w = packed[:, :, O + 2 * H:O + 2 * H + S]
    return logits, h_seq, c_seq, attn_w


def decoder_attn_forward(params, x, hidden, encoder_outputs):
    """Mirrors DecoderAttn.forward(input, hidden, encoder_outputs) (T == 1)."""
    logits, h_seq, c_seq, attn_w = decoder_attn_decode(
        params, x[None], hidden, encoder_outputs)
    return logits[0], (h_seq[0][None], c_seq[0][None]), attn_w[0][:, None, :]


# ---------------------------------------------------------------------------
# Deterministic parameter init (shapes from DecoderAttn.__init__)
# ---------------------------------------------------------------------------
def init_params(key, hidden_dim, output_dim):
    H, O = hidden_dim, output_dim
    ks = jax.random.split(key, 8)
    scale = 0.1
    # nn.LSTM(1, H): weight_ih (4H,1), weight_hh (4H,H), bias_ih (4H), bias_hh (4H)
    w_ih = scale * jax.random.normal(ks[0], (4 * H, 1), jnp.float32)
    w_hh = scale * jax.random.normal(ks[1], (4 * H, H), jnp.float32)
    b_ih = scale * jax.random.normal(ks[2], (4 * H,), jnp.float32)
    b_hh = scale * jax.random.normal(ks[3], (4 * H,), jnp.float32)
    # nn.Linear(H, H)
    w_attn = scale * jax.random.normal(ks[4], (H, H), jnp.float32)
    b_attn = scale * jax.random.normal(ks[5], (H,), jnp.float32)
    # nn.Linear(2H, O)
    w_fc = scale * jax.random.normal(ks[6], (O, 2 * H), jnp.float32)
    b_fc = scale * jax.random.normal(ks[7], (O,), jnp.float32)

    # ---- pack everything into ONE 128-lane, 8-row-aligned f32 slab ----
    r_vec, r_af, r_afb, rows, lanes = _slab_layout(H, O)
    slab = jnp.zeros((rows, lanes), jnp.float32)
    slab = slab.at[0:H, 0:4 * H].set(w_hh.T)                        # gate weights (i|f|g|o)
    slab = slab.at[r_vec, 0:4 * H].set(w_ih[:, 0])                  # input weights (K=1 row)
    slab = slab.at[r_vec + 1, 0:4 * H].set(b_ih + b_hh)             # combined gate bias
    slab = slab.at[r_af:r_af + H, 0:H].set(w_attn.T)                # attn projection
    slab = slab.at[r_af:r_af + H, H:H + O].set(w_fc.T[:H, :])       # fc, h_new half
    slab = slab.at[r_af:r_af + H, H + O:H + 2 * O].set(w_fc.T[H:, :])  # fc, context half
    slab = slab.at[r_afb, 0:H].set(b_attn)
    slab = slab.at[r_afb, H:H + O].set(b_fc)

    params = dict(w_slab=slab, hidden_dim=H, output_dim=O)
    raw = dict(w_ih=w_ih, w_hh=w_hh, b_ih=b_ih, b_hh=b_hh,
               w_attn=w_attn, b_attn=b_attn, w_fc=w_fc, b_fc=b_fc)
    return params, raw


# ---------------------------------------------------------------------------
# Pure-JAX reference (mirrors the PyTorch forward exactly; dropout never used
# in the reference forward either)
# ---------------------------------------------------------------------------
def reference_forward(raw, x, hidden, enc):
    h0, c0 = hidden
    h, c = h0[0], c0[0]
    H = h.shape[-1]
    gates = x @ raw["w_ih"].T + h @ raw["w_hh"].T + raw["b_ih"] + raw["b_hh"]
    i = jax.nn.sigmoid(gates[:, 0 * H:1 * H])
    f = jax.nn.sigmoid(gates[:, 1 * H:2 * H])
    g = jnp.tanh(gates[:, 2 * H:3 * H])
    o = jax.nn.sigmoid(gates[:, 3 * H:4 * H])
    c_new = f * c + i * g
    h_new = o * jnp.tanh(c_new)
    q = h_new @ raw["w_attn"].T + raw["b_attn"]
    scores = jnp.einsum("bh,bsh->bs", q, enc)
    attn_w = jax.nn.softmax(scores, axis=-1)
    context = jnp.einsum("bs,bsh->bh", attn_w, enc)
    logits = jnp.concatenate([h_new, context], -1) @ raw["w_fc"].T + raw["b_fc"]
    return logits, (h_new[None], c_new[None]), attn_w[:, None, :]


# ---------------------------------------------------------------------------
if __name__ == "__main__":
    B, H, S, O, T = 2, 32, 8, 16, 4

    key = jax.random.PRNGKey(0)
    k_p, k_x, k_h, k_c, k_e = jax.random.split(key, 5)
    params, raw = init_params(k_p, H, O)

    x_seq = jax.random.normal(k_x, (T, B, 1), jnp.float32)        # decoder inputs
    h0 = jax.random.normal(k_h, (1, B, H), jnp.float32)
    c0 = jax.random.normal(k_c, (1, B, H), jnp.float32)
    enc = jax.random.normal(k_e, (B, S, H), jnp.float32)          # encoder_outputs

    # ---- single step: exactly DecoderAttn.forward ----
    logits, (h1, c1), attn_w = decoder_attn_forward(params, x_seq[0], (h0, c0), enc)
    jax.block_until_ready((logits, h1, c1, attn_w))

    r_logits, (r_h, r_c), r_attn = reference_forward(raw, x_seq[0], (h0, c0), enc)
    np.testing.assert_allclose(np.asarray(logits), np.asarray(r_logits), rtol=1e-4, atol=1e-5)
    np.testing.assert_allclose(np.asarray(h1), np.asarray(r_h), rtol=1e-4, atol=1e-5)
    np.testing.assert_allclose(np.asarray(c1), np.asarray(r_c), rtol=1e-4, atol=1e-5)
    np.testing.assert_allclose(np.asarray(attn_w), np.asarray(r_attn), rtol=1e-4, atol=1e-5)

    # ---- T teacher-forced steps inside ONE pallas_call ----
    lg_seq, h_seq, c_seq, aw_seq = decoder_attn_decode(params, x_seq, (h0, c0), enc)
    jax.block_until_ready((lg_seq, h_seq, c_seq, aw_seq))

    h, c = h0, c0
    for t in range(T):
        r_lg, (h, c), r_aw = reference_forward(raw, x_seq[t], (h, c), enc)
        np.testing.assert_allclose(np.asarray(lg_seq[t]), np.asarray(r_lg), rtol=1e-4, atol=3e-5)
        np.testing.assert_allclose(np.asarray(h_seq[t]), np.asarray(h[0]), rtol=1e-4, atol=3e-5)
        np.testing.assert_allclose(np.asarray(c_seq[t]), np.asarray(c[0]), rtol=1e-4, atol=3e-5)
        np.testing.assert_allclose(np.asarray(aw_seq[t]), np.asarray(r_aw[:, 0, :]),
                                   rtol=1e-4, atol=3e-5)

    print("KERNEL_OK")
</pallas_src>

<mosaic_0001>
module attributes {stable_mosaic.version = 11 : i64} {
  func.func @decoder_attn_kernel(%arg0: i32, %arg1: memref<1x2x1xf32, #tpu.memory_space<vmem>>, %arg2: memref<2x64xf32, #tpu.memory_space<vmem>>, %arg3: memref<2x8x32xf32, #tpu.memory_space<vmem>>, %arg4: memref<80x128xf32, #tpu.memory_space<vmem>>, %arg5: memref<1x2x128xf32, #tpu.memory_space<vmem>>, %arg6: memref<2x64xf32, #tpu.memory_space<vmem>>) attributes {dimension_semantics = [#tpu.dimension_semantics<arbitrary>], iteration_bounds = array<i64: 1>, scalar_prefetch = 0 : i64, scratch_operands = 1 : i64, tpu.core_type = #tpu.core_type<tc>, window_params = [{pipeline_mode = #tpu.pipeline_mode<synchronous>, transform_indices = @transform_0, window_bounds = array<i64: 1, 2, 1>}, {pipeline_mode = #tpu.pipeline_mode<synchronous>, transform_indices = @transform_1, window_bounds = array<i64: 2, 64>}, {pipeline_mode = #tpu.pipeline_mode<synchronous>, transform_indices = @transform_2, window_bounds = array<i64: 2, 8, 32>}, {pipeline_mode = #tpu.pipeline_mode<synchronous>, transform_indices = @transform_3, window_bounds = array<i64: 80, 128>}, {transform_indices = @transform_4, window_bounds = array<i64: 1, 2, 128>}]} {
    %c0_i32 = arith.constant 0 : i32
    %0 = arith.cmpi eq, %arg0, %c0_i32 : i32
    %1 = arith.extui %0 : i1 to i32
    %c0_i32_0 = arith.constant 0 : i32
    %2 = arith.cmpi ne, %1, %c0_i32_0 : i32
    scf.if %2 {
      %c0_31 = arith.constant 0 : index
      %c0_32 = arith.constant 0 : index
      %78 = vector.load %arg2[%c0_31, %c0_32] : memref<2x64xf32, #tpu.memory_space<vmem>>, vector<2x64xf32>
      %c0_33 = arith.constant 0 : index
      %c0_34 = arith.constant 0 : index
      %79 = vector.load %arg6[%c0_33, %c0_34] : memref<2x64xf32, #tpu.memory_space<vmem>>, vector<2x64xf32>
      tpu.vector_store %arg6[%c0_33, %c0_34], %78 {strides = array<i32>} : memref<2x64xf32, #tpu.memory_space<vmem>>, vector<2x64xf32>,
    } else {
    }
    %c0 = arith.constant 0 : index
    %c0_1 = arith.constant 0 : index
    %3 = vector.load %arg6[%c0, %c0_1] : memref<2x64xf32, #tpu.memory_space<vmem>>, vector<2x32xf32>
    %c0_2 = arith.constant 0 : index
    %c32 = arith.constant 32 : index
    %4 = vector.load %arg6[%c0_2, %c32] : memref<2x64xf32, #tpu.memory_space<vmem>>, vector<2x32xf32>
    %5 = arith.index_cast %arg0 : i32 to index
    %c0_3 = arith.constant 0 : index
    %c0_4 = arith.constant 0 : index
    %6 = vector.load %arg1[%5, %c0_3, %c0_4] : memref<1x2x1xf32, #tpu.memory_space<vmem>>, vector<1x2x1xf32>
    %7 = vector.shape_cast %6 : vector<1x2x1xf32> to vector<2x1xf32>
    %c0_5 = arith.constant 0 : index
    %c0_6 = arith.constant 0 : index
    %8 = vector.load %arg4[%c0_5, %c0_6] : memref<80x128xf32, #tpu.memory_space<vmem>>, vector<32x128xf32>
    %cst = arith.constant dense<0.000000e+00> : vector<2x128xf32>
    %9 = tpu.matmul %3, %8, %cst {dimension_numbers = #tpu.dot_dimension_numbers<[1], [0], [0], [1], [0, 0, 1, 1], [], []>} : vector<2x32xf32>, vector<32x128xf32>, vector<2x128xf32> -> vector<2x128xf32>
    %c32_7 = arith.constant 32 : index
    %c0_8 = arith.constant 0 : index
    %10 = vector.load %arg4[%c32_7, %c0_8] : memref<80x128xf32, #tpu.memory_space<vmem>>, vector<1x128xf32>
    %11 = vector.broadcast %7 : vector<2x1xf32> to vector<2x128xf32>
    %12 = vector.broadcast %10 : vector<1x128xf32> to vector<2x128xf32>
    %13 = arith.mulf %11, %12 : vector<2x128xf32>
    %14 = arith.addf %9, %13 : vector<2x128xf32>
    %c33 = arith.constant 33 : index
    %c0_9 = arith.constant 0 : index
    %15 = vector.load %arg4[%c33, %c0_9] : memref<80x128xf32, #tpu.memory_space<vmem>>, vector<1x128xf32>
    %16 = vector.broadcast %15 : vector<1x128xf32> to vector<2x128xf32>
    %17 = arith.addf %14, %16 : vector<2x128xf32>
    %18 = vector.extract_strided_slice %17 {offsets = [0, 0], sizes = [2, 32], strides = [1, 1]} : vector<2x128xf32> to vector<2x32xf32>
    %19 = arith.negf %18 : vector<2x32xf32>
    %20 = math.exp %19 : vector<2x32xf32>
    %cst_10 = arith.constant 1.000000e+00 : f32
    %21 = vector.broadcast %cst_10 : f32 to vector<2x32xf32>
    %22 = arith.addf %21, %20 : vector<2x32xf32>
    %23 = arith.divf %21, %22 : vector<2x32xf32>
    %24 = vector.extract_strided_slice %17 {offsets = [0, 32], sizes = [2, 32], strides = [1, 1]} : vector<2x128xf32> to vector<2x32xf32>
    %25 = arith.negf %24 : vector<2x32xf32>
    %26 = math.exp %25 : vector<2x32xf32>
    %cst_11 = arith.constant 1.000000e+00 : f32
    %27 = vector.broadcast %cst_11 : f32 to vector<2x32xf32>
    %28 = arith.addf %27, %26 : vector<2x32xf32>
    %29 = arith.divf %27, %28 : vector<2x32xf32>
    %30 = vector.extract_strided_slice %17 {offsets = [0, 64], sizes = [2, 32], strides = [1, 1]} : vector<2x128xf32> to vector<2x32xf32>
    %31 = math.tanh %30 : vector<2x32xf32>
    %32 = vector.extract_strided_slice %17 {offsets = [0, 96], sizes = [2, 32], strides = [1, 1]} : vector<2x128xf32> to vector<2x32xf32>
    %33 = arith.negf %32 : vector<2x32xf32>
    %34 = math.exp %33 : vector<2x32xf32>
    %cst_12 = arith.constant 1.000000e+00 : f32
    %35 = vector.broadcast %cst_12 : f32 to vector<2x32xf32>
    %36 = arith.addf %35, %34 : vector<2x32xf32>
    %37 = arith.divf %35, %36 : vector<2x32xf32>
    %38 = arith.mulf %29, %4 : vector<2x32xf32>
    %39 = arith.mulf %23, %31 : vector<2x32xf32>
    %40 = arith.addf %38, %39 : vector<2x32xf32>
    %41 = math.tanh %40 : vector<2x32xf32>
    %42 = arith.mulf %37, %41 : vector<2x32xf32>
    %c40 = arith.constant 40 : index
    %c0_13 = arith.constant 0 : index
    %43 = vector.load %arg4[%c40, %c0_13] : memref<80x128xf32, #tpu.memory_space<vmem>>, vector<32x48xf32>
    %cst_14 = arith.constant dense<0.000000e+00> : vector<2x48xf32>
    %44 = tpu.matmul %42, %43, %cst_14 {dimension_numbers = #tpu.dot_dimension_numbers<[1], [0], [0], [1], [0, 0, 1, 1], [], []>} : vector<2x32xf32>, vector<32x48xf32>, vector<2x48xf32> -> vector<2x48xf32>
    %c72 = arith.constant 72 : index
    %c0_15 = arith.constant 0 : index
    %45 = vector.load %arg4[%c72, %c0_15] : memref<80x128xf32, #tpu.memory_space<vmem>>, vector<1x48xf32>
    %46 = vector.broadcast %45 : vector<1x48xf32> to vector<2x48xf32>
    %47 = arith.addf %44, %46 : vector<2x48xf32>
    %48 = vector.extract_strided_slice %47 {offsets = [0, 0], sizes = [2, 32], strides = [1, 1]} : vector<2x48xf32> to vector<2x32xf32>
    %49 = vector.extract_strided_slice %47 {offsets = [0, 32], sizes = [2, 16], strides = [1, 1]} : vector<2x48xf32> to vector<2x16xf32>
    %c0_16 = arith.constant 0 : index
    %c0_17 = arith.constant 0 : index
    %c0_18 = arith.constant 0 : index
    %50 = vector.load %arg3[%c0_16, %c0_17, %c0_18] : memref<2x8x32xf32, #tpu.memory_space<vmem>>, vector<2x8x32xf32>
    %51 = vector.shape_cast %48 : vector<2x32xf32> to vector<2x1x32xf32>
    %52 = vector.broadcast %51 : vector<2x1x32xf32> to vector<2x8x32xf32>
    %53 = arith.mulf %52, %50 : vector<2x8x32xf32>
    %cst_19 = arith.constant dense<0.000000e+00> : vector<2x8xf32>
    %54 = vector.multi_reduction <add>, %53, %cst_19 [2] : vector<2x8x32xf32> to vector<2x8xf32>
    %cst_20 = arith.constant dense<0xFF800000> : vector<2xf32>
    %55 = vector.multi_reduction <maximumf>, %54, %cst_20 [1] : vector<2x8xf32> to vector<2xf32>
    %56 = vector.shape_cast %55 : vector<2xf32> to vector<2x1xf32>
    %57 = vector.broadcast %56 : vector<2x1xf32> to vector<2x8xf32>
    %58 = arith.subf %54, %57 : vector<2x8xf32>
    %59 = math.exp %58 : vector<2x8xf32>
    %cst_21 = arith.constant dense<0.000000e+00> : vector<2xf32>
    %60 = vector.multi_reduction <add>, %59, %cst_21 [1] : vector<2x8xf32> to vector<2xf32>
    %61 = vector.shape_cast %60 : vector<2xf32> to vector<2x1xf32>
    %62 = vector.broadcast %61 : vector<2x1xf32> to vector<2x8xf32>
    %63 = arith.divf %59, %62 : vector<2x8xf32>
    %64 = vector.shape_cast %63 : vector<2x8xf32> to vector<2x8x1xf32>
    %65 = vector.broadcast %64 : vector<2x8x1xf32> to vector<2x8x32xf32>
    %66 = arith.mulf %65, %50 : vector<2x8x32xf32>
    %cst_22 = arith.constant dense<0.000000e+00> : vector<2x32xf32>
    %67 = vector.multi_reduction <add>, %66, %cst_22 [1] : vector<2x8x32xf32> to vector<2x32xf32>
    %c40_23 = arith.constant 40 : index
    %c48 = arith.constant 48 : index
    %68 = vector.load %arg4[%c40_23, %c48] : memref<80x128xf32, #tpu.memory_space<vmem>>, vector<32x16xf32>
    %cst_24 = arith.constant dense<0.000000e+00> : vector<2x16xf32>
    %69 = tpu.matmul %67, %68, %cst_24 {dimension_numbers = #tpu.dot_dimension_numbers<[1], [0], [0], [1], [0, 0, 1, 1], [], []>} : vector<2x32xf32>, vector<32x16xf32>, vector<2x16xf32> -> vector<2x16xf32>
    %70 = arith.addf %49, %69 : vector<2x16xf32>
    %71 = tpu.concatenate %42, %40 in 1 : vector<2x32xf32>, vector<2x32xf32> -> vector<2x64xf32>
    %c0_25 = arith.constant 0 : index
    %c0_26 = arith.constant 0 : index
    %72 = vector.load %arg6[%c0_25, %c0_26] : memref<2x64xf32, #tpu.memory_space<vmem>>, vector<2x64xf32>
    tpu.vector_store %arg6[%c0_25, %c0_26], %71 {strides = array<i32>} : memref<2x64xf32, #tpu.memory_space<vmem>>, vector<2x64xf32>,
    %cst_27 = arith.constant 0.000000e+00 : f32
    %73 = vector.broadcast %cst_27 : f32 to vector<2x40xf32>
    %74 = tpu.concatenate %70, %42, %40, %63, %73 in 1 : vector<2x16xf32>, vector<2x32xf32>, vector<2x32xf32>, vector<2x8xf32>, vector<2x40xf32> -> vector<2x128xf32>
    %c0_28 = arith.constant 0 : index
    %c0_29 = arith.constant 0 : index
    %c0_30 = arith.constant 0 : index
    %75 = vector.load %arg5[%c0_28, %c0_29, %c0_30] : memref<1x2x128xf32, #tpu.memory_space<vmem>>, vector<1x2x128xf32>
    %76 = vector.shape_cast %75 : vector<1x2x128xf32> to vector<2x128xf32>
    %77 = vector.shape_cast %74 : vector<2x128xf32> to vector<1x2x128xf32>
    tpu.vector_store %arg5[%c0_28, %c0_29, %c0_30], %77 {strides = array<i32>} : memref<1x2x128xf32, #tpu.memory_space<vmem>>, vector<1x2x128xf32>,
    return
  }
  func.func @transform_0(%arg0: i32) -> (i32, i32, i32) {
    %c0_i32 = arith.constant 0 : i32
    %c0_i32_0 = arith.constant 0 : i32
    %c0_i32_1 = arith.constant 0 : i32
    %c0_i32_2 = arith.constant 0 : i32
    return %c0_i32, %c0_i32_0, %c0_i32_1 : i32, i32, i32
  }
  func.func @transform_1(%arg0: i32) -> (i32, i32) {
    %c0_i32 = arith.constant 0 : i32
    %c0_i32_0 = arith.constant 0 : i32
    %c0_i32_1 = arith.constant 0 : i32
    return %c0_i32, %c0_i32_0 : i32, i32
  }
  func.func @transform_2(%arg0: i32) -> (i32, i32, i32) {
    %c0_i32 = arith.constant 0 : i32
    %c0_i32_0 = arith.constant 0 : i32
    %c0_i32_1 = arith.constant 0 : i32
    %c0_i32_2 = arith.constant 0 : i32
    return %c0_i32, %c0_i32_0, %c0_i32_1 : i32, i32, i32
  }
  func.func @transform_3(%arg0: i32) -> (i32, i32) {
    %c0_i32 = arith.constant 0 : i32
    %c0_i32_0 = arith.constant 0 : i32
    %c0_i32_1 = arith.constant 0 : i32
    return %c0_i32, %c0_i32_0 : i32, i32
  }
  func.func @transform_4(%arg0: i32) -> (i32, i32, i32) {
    %c0_i32 = arith.constant 0 : i32
    %c0_i32_0 = arith.constant 0 : i32
    %c0_i32_1 = arith.constant 0 : i32
    return %arg0, %c0_i32, %c0_i32_0 : i32, i32, i32
  }
}

</mosaic_0001>

<bundles_post_ra>
// kernel: tpu_custom_call.1
= control target key start
LH: loop header
LB: loop body
LE: loop exit
PB: predicated region body
PF: predicated region fallthrough
CT: control target
= control target key end

     0   :  { %9 = vsyncpa [#allocation4], 0  ;;  %s892_s0 = inlined_call_operand.vmem [shape: f32[1,2,1], index: 0, kind: input, shape index: {}]   ;;  %s893_s1 = inlined_call_operand.vmem [shape: f32[2,64], index: 1, kind: input, shape index: {}]   ;;  %s894_s2 = inlined_call_operand.hbm [shape: f32[2,8,32], index: 2, kind: input, shape index: {}]   ;;  %s895_s3 = inlined_call_operand.hbm [shape: f32[80,128], index: 3, kind: input, shape index: {}]   ;;  %s896_s4 = inlined_call_operand.hbm [shape: f32[1,2,128], index: 4, kind: output, shape index: {}]  }
   0x1   :  { %10 = vsyncpa [#allocation7], 0 }
   0x2   :  { %11 = vsyncpa [#allocation5], 0  ;;  %s741_s15 = smov [#allocation3]   ;;  %s669_s19 = scalar_lea.hbm %s894_s2, 256 }
   0x3   :  { %s21_s16 = sshll.u32 %s741_s15, 4  ;;  %p670_p0 = scmp.ne.s32.totalorder %s894_s2, %s669_s19  ;;  %s22_s16 = int_to_ptr.vmem [resolvable:$true] %s21_s16 }
   0x4   :  { %p673_p1 = scmp.lt.u32.totalorder %s669_s19, %s894_s2 }
   0x6   :  { %p675_p2 = pnand %p673_p1, %p670_p0 }
   0x8   :  { %678 = shalt.err (!%p675_p2)
}
   0x9   :  { %s679_s24 = scalar_lea.vmem %s22_s16, 256  ;;  %p684_p4 = scmp.lt.s32.totalorder %s22_s16, %s22_s16 }
   0xa   :  { %p680_p3 = scmp.ne.s32.totalorder %s22_s16, %s679_s24  ;;  %p685_p5 = scmp.lt.s32.totalorder %s679_s24, %s679_s24 }
   0xc   :  { %p686_p6 = por %p685_p5, %p684_p4 }
   0xe   :  { %p687_p7 = pnand %p686_p6, %p680_p3 }
  0x10   :  { %690 = shalt.err (!%p687_p7)
}
  0x11   :  { %s742_s25 = smov 128   ;;  %s743_s26 = smov 8  }
  0x12   :  { %27 = dma.hbm_to_vmem [thread:$0]  %s894_s2, 256, %s22_s16, [#allocation4], %s742_s25, %s742_s25, %s743_s26  }
  0x13   :  { %s744_s29 = smov [#allocation6]   ;;  %s691_s7 = scalar_lea.hbm %s895_s3, 1280 }
  0x14   :  { %s33_s30 = sshll.u32 %s744_s29, 4  ;;  %p692_p8 = scmp.ne.s32.totalorder %s895_s3, %s691_s7  ;;  %s34_s30 = int_to_ptr.vmem [resolvable:$true] %s33_s30 }
  0x15   :  { %p695_p9 = scmp.lt.u32.totalorder %s691_s7, %s895_s3 }
  0x17   :  { %p697_p10 = pnand %p695_p9, %p692_p8 }
  0x19   :  { %700 = shalt.err (!%p697_p10)
}
  0x1a   :  { %s701_s12 = scalar_lea.vmem %s34_s30, 1280  ;;  %p706_p12 = scmp.lt.s32.totalorder %s34_s30, %s34_s30 }
  0x1b   :  { %p702_p11 = scmp.ne.s32.totalorder %s34_s30, %s701_s12  ;;  %p707_p13 = scmp.lt.s32.totalorder %s701_s12, %s701_s12 }
  0x1d   :  { %p708_p0 = por %p707_p13, %p706_p12 }
  0x1f   :  { %p709_p1 = pnand %p708_p0, %p702_p11 }
  0x21   :  { %712 = shalt.err (!%p709_p1)
}
  0x22   :  { %39 = dma.hbm_to_vmem [thread:$0]  %s895_s3, 1280, %s34_s30, [#allocation7], %s742_s25, %s742_s25, %s743_s26  }
  0x23   :  { %735 = dma.done.wait [#allocation4], 256  }
  0x24   :  { %736 = vsyncadd [#allocation4], 4294967040 }
  0x25   :  { %737 = dma.done.wait [#allocation7], 1280  }
  0x26   :  { %738 = vsyncadd [#allocation7], 4294966016  ;;  %v745_v0 = vmov 0.0|0.0   ;;  %vm746_vm0 = vmmov 0   ;;  %v747_v1 = vmov 0.0   ;;  %v748_v2 = vmov 0  }
  0x27   :  { %607 = vmatprep.subr.bf16.mxu0 %v745_v0  ;;  %582 = vmatprep.mubr.msk.f32.mxu0 %vm746_vm0, %v747_v1  ;;  %vm51_vm1 = vcmask 517120   ;;  %v57_v3 = vld [vmem:[#allocation6] sm:$0xff]  ;;  %v58_v4 = vld [vmem:[#allocation6 + $0x8] sm:$0xff]  ;;  %v59_v5 = vld [vmem:[#allocation6 + $0x10] sm:$0xff]  ;;  %vm72_vm2 = vcmask 261120   ;;  %v266_v43 = vlaneseq  ;;  %vm315_vm3 = vcmask 1041409  }
  0x28   :  { %641 = vset.pattern.permute.xlu0 %v748_v2  ;;  %613 = vmatprep.subr.bf16.mxu1 %v745_v0  ;;  %v608_v6 = vpack.c.bf16 %v58_v4, %v57_v3  ;;  %v60_v7 = vld [vmem:[#allocation6 + $0x18] sm:$0xff]  ;;  %v552_v12 = vld [vmem:[#allocation6 + $0x20] ss:$0 sm:$0xff]  ;;  %v554_v16 = vld [vmem:[#allocation6 + $0x21] ss:$0 sm:$0xff]  ;;  %vm318_vm4 = vcmask 58368  }
  0x29   :  { %593 = vmatprep.mubr.msk.f32.mxu1 %vm746_vm0, %v747_v1  ;;  %642 = vset.pattern.permute.xlu1 %v748_v2  ;;  %v50_v8 = vld [vmem:[%s893_s1] sm:$0x3]  ;;  %v611_v10 = vpack.c.bf16 %v60_v7, %v59_v5  ;;  %s750_s1 = smov 32   ;;  %v825_v30 = vld [vmem:[#allocation6 + $0x28] sm:$0xff]  ;;  %v827_v31 = vld [vmem:[#allocation6 + $0x30] sm:$0xff]  ;;  %v846_v45 = vshrl.u32 %v266_v43, 7 }
  0x2a   :  { %v56_v9 = vld [vmem:[%s892_s0] sm:$0x3]  ;;  %52 = vst.msk [vmem:[#allocation2] sm:$0x3] %vm51_vm1, %v50_v8  ;;  %609 = vmatpush3.bf16.msra.mxu0 %v608_v6  ;;  %s749_s0 = smov 64   ;;  %v614_v33 = vpack.c.bf16 %v827_v31, %v825_v30  ;;  %v833_v34 = vld [vmem:[#allocation6 + $0x40] sm:$0xff] }
  0x2b   :  { %64 = vperm.xlu0 %641, %v56_v9   ;;  %610 = vmatprep.subr.bf16.mxu0 %v745_v0  ;;  %v829_v32 = vld [vmem:[#allocation6 + $0x38] sm:$0xff]  ;;  %v751_v41 = vmov 1966171168   ;;  %v556_v46 = vld [vmem:[#allocation6 + $0x48] ss:$0 sm:$0xff]  ;;  %v287_v52 = vsub.s32 0, %v846_v45 }
  0x2c   :  { %615 = vmatpush3.bf16.msra.mxu1 %v614_v33  ;;  %v617_v35 = vpack.c.bf16 %v833_v34, %v829_v32  ;;  %v264_v42 = vunpack.c.l.s4 %v751_v41  ;;  %v260_v55 = vld [vmem:[#allocation3] sm:$0xff]  ;;  %v853_v58 = vld [vmem:[#allocation3 + $0x8] sm:$0xff]  ;;  %v329_v9 = vsub.s32 1, %v846_v45  ;;  %s752_s17 = smov 80   ;;  %s753_s18 = smov 48   ;;  %vm527_vm5 = vcmask 130048  }
  0x2d   :  { %616 = vmatprep.subr.bf16.mxu1 %v745_v0  ;;  %s754_s19 = smov 96   ;;  %s755_s20 = smov 16   ;;  %vm529_vm6 = vcmask 392192   ;;  %vm531_vm7 = vcmask 654336   ;;  %vm533_vm8 = vcmask 719872  }
  0x2e   :  { %612 = vmatpush3.bf16.msra.mxu0 %v611_v10  ;;  %v265_v44 = vunpack.c.0.s8 %v264_v42  ;;  %s756_s21 = smov [#allocation8]  }
  0x2f   :  { %619 = vmatprep.subr.bf16.mxu0 %v745_v0  ;;  %s542_s22 = sshll.u32 %s756_s21, 4  ;;  %s543_s22 = int_to_ptr.vmem [resolvable:$true] %s542_s22 }
  0x30   :  { %618 = vmatpush3.bf16.msra.mxu1 %v617_v35  ;;  %v268_v47 = vsub.s32 %v265_v44, %v846_v45  ;;  %s713_s23 = scalar_lea.vmem %s543_s22, 32  ;;  %p718_p3 = scmp.lt.s32.totalorder %s543_s22, %s543_s22 }
  0x31   :  { %v53_v11 = vld [vmem:[#allocation2] sm:$0x3]  ;;  %p714_p2 = scmp.ne.s32.totalorder %s543_s22, %s713_s23  ;;  %p719_p4 = scmp.lt.s32.totalorder %s713_s23, %s713_s23 }
  0x32   :  { %583 = vmatmul.mubr.msk.f32.vlgmr.msra.gmra.mrb[0].mxu0 %vm72_vm2, %v53_v11 }
  0x33   :  { %604 = vmatprep.mubr.msk.f32.mxu0 %vm746_vm0, %v747_v1  ;;  %v306_v1 = vand.u32 127, %v266_v43  ;;  %p720_p5 = por %p719_p4, %p718_p3 }
  0x35   :  { %v309_v2 = vsub.s32 %v306_v1, %v846_v45  ;;  %p721_p6 = pnand %p720_p5, %p714_p2 }
  0xaa   :  { %v65_v13 = vpop.permute.xlu0 %64 }
  0xab   :  { %v71_v14 = vmul.f32 %v552_v12, %v65_v13 }
 0x105   :  { %v142_v15 = vpop.f32.mrb[0].mxu0 }
 0x106   :  { %v143_v17 = vadd.f32 %v142_v15, %v71_v14  ;;  %v584_v18 = vpop.f32.mrb[1].mxu0 }
 0x108   :  { %v151_v19 = vadd.f32 %v554_v16, %v143_v17 }
 0x10a   :  { %653 = vtanh.f32 %v151_v19  ;;  %v555_v21 = vmul.f32 -1.442695, %v151_v19 }
 0x10c   :  { %655 = vpow2.f32 %v555_v21 }
 0x114   :  { %v654_v20 = vpop.eup %653 }
 0x115   :  { %161 = vrot.lane.b32.xlu0 %v654_v20, %s749_s0 }
 0x116   :  { %v656_v22 = vpop.eup %655 }
 0x117   :  { %v155_v23 = vadd.f32 1.0, %v656_v22 }
 0x119   :  { %657 = vrcp.f32 %v155_v23 }
 0x123   :  { %v658_v24 = vpop.eup %657 }
 0x124   :  { %v159_v27 = vmul.f32 %v658_v24, %v53_v11 }
 0x187   :  { %v162_v25 = vpop.permute.xlu0 %161 }
 0x188   :  { %v164_v26 = vmul.f32 %v658_v24, %v162_v25 }
 0x18a   :  { %166 = vrot.lane.b32.xlu1 %v164_v26, %s750_s1 }
 0x1fc   :  { %v167_v28 = vpop.permute.xlu1 %166 }
 0x1fd   :  { %v822_v29 = vadd.f32 %v167_v28, %v159_v27 }
 0x1ff   :  { %659 = vtanh.f32 %v822_v29 }
 0x209   :  { %v660_v36 = vpop.eup %659 }
 0x20a   :  { %172 = vrot.lane.b32.xlu1 %v660_v36, %s749_s0 }
 0x27c   :  { %v173_v37 = vpop.permute.xlu1 %172 }
 0x27d   :  { %v838_v38 = vmul.f32 %v658_v24, %v173_v37  ;;  %v643_v37 = vpack.i.bf16 %v827_v31, %v825_v30 }
 0x27f   :  { %186 = vrot.lane.b32.xlu0 %v838_v38, %s750_s1 }
 0x2f1   :  { %v187_v39 = vpop.permute.xlu0 %186 }
 0x2f2   :  { %v502_v40 = vsel %vm72_vm2, %v187_v39, %v822_v29  ;;  %594 = vmatmul.mubr.msk.f32.vlgmr.msra.gmra.mrb[0].mxu1 %vm72_vm2, %v187_v39  ;;  %v648_v39 = vpack.i.bf16 %v833_v34, %v829_v32 }
 0x2f3   :  { %504 = vst.msk [vmem:[#allocation2] sm:$0x3] %vm51_vm1, %v502_v40  ;;  %v516_v40 = vadd.s32 4294967216, %v306_v1 }
 0x2f5   :  { %v519_v42 = vsub.s32 %v516_v40, %v846_v45 }
 0x3c5   :  { %v256_v48 = vpop.f32.mrb[0].mxu1 }
 0x3c6   :  { %v849_v49 = vadd.f32 %v556_v46, %v256_v48  ;;  %v595_v50 = vpop.f32.mrb[1].mxu1 }
 0x3c8   :  { %v269_v51 = vrot.slane %v849_v49, %v268_v47 }
 0x3ca   :  { %v270_v53 = vcombine.high %v269_v51, %v269_v51  ;;  %v277_v54 = vrot.slane %v269_v51, %v268_v47 }
 0x3cc   :  { %v288_v56 = vrot.slane %v277_v54, %v287_v52  ;;  %v284_v57 = vrot.slane %v270_v53, %v268_v47 }
 0x3ce   :  { %v295_v59 = vmul.f32 %v288_v56, %v260_v55  ;;  %v292_v60 = vrot.slane %v284_v57, %v287_v52 }
 0x3d0   :  { %v297_v61 = vsel %vm72_vm2, %v295_v59, 0.0  ;;  %v296_v62 = vmul.f32 %v292_v60, %v853_v58 }
 0x3d1   :  { %298 = vadd.xlane.f32.xlu1 %v297_v61 }
 0x3d2   :  { %v300_v63 = vsel %vm72_vm2, %v296_v62, 0.0 }
 0x3d3   :  { %301 = vadd.xlane.f32.xlu0 %v300_v63 }
 0x45e   :  { %v299_v3 = vpop.xlane.xlu1 %298 }
 0x45f   :  { %v310_v5 = vrot.slane %v299_v3, %v309_v2 }
 0x460   :  { %v302_v4 = vpop.xlane.xlu0 %301 }
 0x461   :  { %v314_v6 = vrot.slane %v302_v4, %v309_v2 }
 0x463   :  { %v316_v7 = vsel %vm315_vm3, %v314_v6, %v310_v5 }
 0x464   :  { %v319_v8 = vsel %vm318_vm4, %v316_v7, -inf }
 0x465   :  { %320 = vmax.xlane.f32.xlu0 %v319_v8 }
 0x4f2   :  { %v321_v10 = vpop.xlane.xlu0 %320 }
 0x4f3   :  { %v326_v11 = vrot.slane %v321_v10, %v287_v52  ;;  %v330_v12 = vrot.slane %v321_v10, %v329_v9 }
 0x4f5   :  { %v333_v13 = vsub.f32 %v299_v3, %v326_v11  ;;  %v334_v14 = vsub.f32 %v302_v4, %v330_v12 }
 0x4f7   :  { %v335_v15 = vmul.f32 1.442695, %v333_v13  ;;  %v337_v16 = vmul.f32 1.442695, %v334_v14 }
 0x4f9   :  { %661 = vpow2.f32 %v335_v15 }
 0x4fa   :  { %663 = vpow2.f32 %v337_v16 }
 0x503   :  { %v662_v17 = vpop.eup %661 }
 0x504   :  { %v664_v18 = vpop.eup %663  ;;  %342 = vperm.xlu1 %642, %v662_v17  }
 0x505   :  { %345 = vperm.xlu0 %641, %v664_v18  }
 0x583   :  { %v343_v19 = vpop.permute.xlu1 %342 }
 0x584   :  { %v346_v20 = vpop.permute.xlu0 %345  ;;  %v350_v21 = vrot.slane %v343_v19, %v309_v2 }
 0x585   :  { %v354_v22 = vrot.slane %v346_v20, %v309_v2 }
 0x587   :  { %v355_v23 = vsel %vm315_vm3, %v354_v22, %v350_v21 }
 0x588   :  { %v357_v24 = vsel %vm318_vm4, %v355_v23, 0.0 }
 0x589   :  { %358 = vadd.xlane.f32.xlu1 %v357_v24 }
 0x616   :  { %v359_v25 = vpop.xlane.xlu1 %358 }
 0x617   :  { %v364_v26 = vrot.slane %v359_v25, %v287_v52  ;;  %v368_v27 = vrot.slane %v359_v25, %v329_v9 }
 0x619   :  { %665 = vrcp.f32 %v364_v26 }
 0x61a   :  { %667 = vrcp.f32 %v368_v27 }
 0x623   :  { %v666_v28 = vpop.eup %665 }
 0x624   :  { %v372_v33 = vmul.f32 %v666_v28, %v662_v17  ;;  %v668_v35 = vpop.eup %667 }
 0x625   :  { %v374_v36 = vmul.f32 %v668_v35, %v664_v18 }
 0x626   :  { %377 = vperm.xlu0 %641, %v372_v33  }
 0x62a   :  { %382 = vperm.xlu0 %641, %v374_v36  }
 0x62e   :  { %644 = vrot.lane.b32.xlu0 %v643_v37, %s752_s17 }
 0x632   :  { %649 = vrot.lane.b32.xlu0 %v648_v39, %s752_s17 }
 0x6a5   :  { %v378_v41 = vpop.permute.xlu0 %377 }
 0x6a6   :  { %v385_v43 = vmul.f32 %v378_v41, %v260_v55  ;;  %v520_v48 = vrot.slane %v378_v41, %v519_v42 }
 0x6a8   :  { %v387_v44 = vsel %vm72_vm2, %v385_v43, 0.0 }
 0x6a9   :  { %v388_v46 = vrot.slane %v387_v44, 4  ;;  %v383_v47 = vpop.permute.xlu0 %382 }
 0x6aa   :  { %v386_v50 = vmul.f32 %v383_v47, %v853_v58  ;;  %v524_v51 = vrot.slane %v383_v47, %v519_v42 }
 0x6ab   :  { %v389_v30 = vadd.f32 %v388_v46, %v387_v44 }
 0x6ac   :  { %v394_v31 = vsel %vm72_vm2, %v386_v50, 0.0  ;;  %v525_v52 = vsel %vm315_vm3, %v524_v51, %v520_v48 }
 0x6ad   :  { %v390_v32 = vrot.slane %v389_v30, 2  ;;  %v395_v34 = vrot.slane %v394_v31, 4  ;;  %v645_v53 = vpop.permute.xlu0 %644 }
 0x6ae   :  { %v647_v54 = vunpack.i.h.bf16 %v645_v53  ;;  %v646_v56 = vunpack.i.l.bf16 %v645_v53 }
 0x6af   :  { %v391_v45 = vadd.f32 %v390_v32, %v389_v30  ;;  %v396_v55 = vadd.f32 %v395_v34, %v394_v31 }
 0x6b0   :  { %v620_v57 = vpack.c.bf16 %v647_v54, %v646_v56 }
 0x6b1   :  { %v397_v59 = vrot.slane %v396_v55, 2  ;;  %v650_v60 = vpop.permute.xlu0 %649  ;;  %v392_v58 = vrot.slane %v391_v45, 1 }
 0x6b2   :  { %v652_v61 = vunpack.i.h.bf16 %v650_v60  ;;  %v651_v62 = vunpack.i.l.bf16 %v650_v60  ;;  %621 = vmatpush3.bf16.msra.mxu0 %v620_v57 }
 0x6b3   :  { %v398_v63 = vadd.f32 %v397_v59, %v396_v55  ;;  %622 = vmatprep.subr.bf16.mxu0 %v745_v0  ;;  %v393_v3 = vadd.f32 %v392_v58, %v391_v45 }
 0x6b4   :  { %v623_v1 = vpack.c.bf16 %v652_v61, %v651_v62 }
 0x6b5   :  { %v399_v2 = vrot.slane %v398_v63, 1 }
 0x6b6   :  { %624 = vmatpush3.bf16.msra.mxu0 %v623_v1 }
 0x6b7   :  { %v400_v4 = vadd.f32 %v399_v2, %v398_v63 }
 0x6b9   :  { %v407_v5 = vsel %vm315_vm3, %v400_v4, %v393_v3 }
 0x6ba   :  { %605 = vmatmul.mubr.msk.f32.vlgmr.msra.gmra.mrb[2].mxu0 %vm72_vm2, %v407_v5 }
 0x78d   :  { %v492_v6 = vpop.f32.mrb[2].mxu0 }
 0x78e   :  { %497 = vrot.lane.b32.xlu0 %v492_v6, %s750_s1  ;;  %v606_v7 = vpop.f32.mrb[3].mxu0 }
 0x792   :  { %509 = vrot.lane.b32.xlu0 %v838_v38, %s753_s18 }
 0x800   :  { %v498_v8 = vpop.permute.xlu0 %497 }
 0x801   :  { %v500_v9 = vadd.f32 %v498_v8, %v849_v49 }
 0x803   :  { %506 = vrot.lane.b32.xlu0 %v500_v9, %s754_s19 }
 0x804   :  { %v510_v0 = vpop.permute.xlu0 %509 }
 0x807   :  { %513 = vrot.lane.b32.xlu0 %v822_v29, %s755_s20 }
 0x875   :  { %v507_v10 = vpop.permute.xlu0 %506 }
 0x876   :  { %v528_v11 = vsel %vm527_vm5, %v507_v10, %v510_v0 }
 0x879   :  { %v514_v12 = vpop.permute.xlu0 %513 }
 0x87a   :  { %v530_v13 = vsel %vm529_vm6, %v528_v11, %v514_v12 }
 0x87b   :  { %v532_v38 = vsel %vm531_vm7, %v530_v13, %v525_v52 }
 0x87c   :  { %v534_v14 = vsel %vm533_vm8, %v532_v38, 0.0 }
 0x87d   :  { %535 = vst [vmem:[#allocation8] sm:$0x3] %v534_v14 }
 0x87e   :  { %724 = shalt.err (!%p721_p6)
}
 0x87f   :  { %s725_s26 = scalar_lea.hbm %s896_s4, 32 }
 0x880   :  { %p726_p7 = scmp.ne.s32.totalorder %s896_s4, %s725_s26  ;;  %p729_p8 = scmp.lt.u32.totalorder %s725_s26, %s896_s4 }
 0x882   :  { %p731_p9 = pnand %p729_p8, %p726_p7 }
 0x884   :  { %734 = shalt.err (!%p731_p9)
}
 0x885   :  { %545 = dma.vmem_to_hbm [thread:$0]  %s543_s22, 32, %s896_s4, [#allocation5]  }
 0x886   :  { %739 = dma.done.wait [#allocation5], 32  }
 0x887   :  { %740 = vsyncadd [#allocation5], 4294967264 }
 0x888   :  { %549 = vsyncpa [#allocation4], 1 }
 0x889   :  { %550 = vsyncpa [#allocation7], 1 }
 0x88a   :  { %551 = vsyncpa [#allocation5], 1 }

</bundles_post_ra>
